<compile_context>
chip_gen: v6e
topology: v6e:2x2x1
jax: 0.10.0
libtpu: 0.0.40
codegen_flags: <defaults>
</compile_context>

<pallas_src>
import math
from functools import partial

import jax
import jax.numpy as jnp
from jax import lax
from jax.experimental import pallas as pl
from jax.experimental.pallas import tpu as pltpu

# ---- "ICNNConfig" defaults (synthetic, deterministic) ----
CFG_EPS = 1e-6
CFG_INIT_SCALE = 1.0
CFG_USE_LAYER_NORM = True
CFG_ACTIVATION = "softplus"
LN_EPS = 1e-5  # torch.nn.LayerNorm default


def _round_up(n, m):
    return ((n + m - 1) // m) * m


def convex_layer_kernel(x_ref, z_ref, wx_ref, wz_ref, par_ref, out_ref, *, d_out):
    """One batch tile of the fused ConvexLayer forward.

    x_ref, z_ref : [TB, D_in]    f32 (cast to bf16 in-kernel for the MXU)
    wx_ref       : [D_in, N_pad] bf16   W.T, feature-padded with zeros
    wz_ref       : [D_in, N_pad] bf16   (scale * softplus(pos_w + eps)).T, padded
    par_ref      : [8, N_pad]    f32    row0 = bias, row1 = gamma, row2 = beta
    out_ref      : [TB, N_pad]
    """
    xb = x_ref[...].astype(jnp.bfloat16)
    zb = z_ref[...].astype(jnp.bfloat16)

    # Two accumulating MXU matmuls (bf16 operands, f32 accumulation): the
    # unconstrained x-path and the (pre-scaled, pre-softplus'd) convex z-path.
    y = jnp.dot(xb, wx_ref[...], preferred_element_type=jnp.float32)
    y = y + jnp.dot(zb, wz_ref[...], preferred_element_type=jnp.float32)
    y = y + par_ref[0:1, :]                                    # bias

    # LayerNorm over the real d_out lanes.  Padded feature lanes of y are exactly
    # zero (zero weight columns + zero bias), so unmasked sums over N_pad equal
    # sums over d_out; E[y^2] - mean^2 (clamped) avoids iota/mask VPU work.
    inv_n = jnp.float32(1.0 / d_out)
    mean = jnp.sum(y, axis=-1, keepdims=True) * inv_n
    ex2 = jnp.sum(y * y, axis=-1, keepdims=True) * inv_n
    var = jnp.maximum(ex2 - mean * mean, 0.0)
    # NOTE: zero-padded batch rows give y = bias -> finite stats; they are sliced
    # off in the wrapper and can never become a NaN source.
    y = (y - mean) * lax.rsqrt(var + LN_EPS)
    y = y * par_ref[1:2, :] + par_ref[2:3, :]                  # gamma / beta

    # Convex, non-decreasing activation (numerically stable softplus; EUP path).
    out_ref[...] = jnp.logaddexp(y, 0.0).astype(out_ref.dtype)

    # TODO(synk): training-mode gradient-clip rescale of z_contrib (data-dependent
    # torch.no_grad branch) and the config.activation == 'celu' alternative are
    # intentionally omitted — eval-mode, softplus config only.


def prepare_convex_layer_params(w, b, pos_weights, scale, gamma, beta):
    """One-time (eval-mode) parameter prep, hoisted out of the per-call path.

    Returns (wx, wz, par, d_out) ready to pass to convex_layer_apply; cache and
    reuse these across forward calls when the parameters are static.
    """
    d_out, _ = w.shape
    # 128-lane alignment; prefer 256 (v6e/v7x MXU width) once the dim is large.
    n_pad = _round_up(d_out, 256) if d_out >= 256 else _round_up(d_out, 128)

    pos_w = jax.nn.softplus(pos_weights.astype(jnp.float32) + CFG_EPS)
    pos_w = pos_w * scale.astype(jnp.float32).reshape(())      # fold scale

    pad_n = ((0, 0), (0, n_pad - d_out))
    wx = jnp.pad(w.astype(jnp.float32).T, pad_n).astype(jnp.bfloat16)
    wz = jnp.pad(pos_w.T, pad_n).astype(jnp.bfloat16)

    par = jnp.zeros((8, n_pad), jnp.float32)
    par = par.at[0, :d_out].set(b.astype(jnp.float32))
    par = par.at[1, :d_out].set(gamma.astype(jnp.float32))
    par = par.at[2, :d_out].set(beta.astype(jnp.float32))
    return wx, wz, par, d_out


def convex_layer_apply(x, z, wx, wz, par, d_out, *, block_b=None,
                       out_dtype=jnp.float32):
    """x, z: [B, D_in]; wx, wz: [D_in, N_pad] bf16; par: [8, N_pad] f32."""
    B, d_in = x.shape
    n_pad = wx.shape[1]
    in_itemsize = x.dtype.itemsize
    out_itemsize = jnp.dtype(out_dtype).itemsize

    # ---- generation-aware VMEM budget ----
    try:
        vmem_cap = int(pltpu.get_tpu_info().vmem_capacity_bytes)
    except Exception:
        vmem_cap = 64 * 1024 * 1024          # conservative (v7x per-TC size)
    budget = int(0.8 * vmem_cap)             # headroom for compiler scratch/sems

    # ---- batch tile size from the remaining VMEM budget ----
    fixed = 2 * d_in * n_pad * 2 + 8 * n_pad * 4           # single-buffered residents
    per_row = (2 * 2 * d_in * in_itemsize                  # x, z tiles (double-buffered)
               + 2 * n_pad * out_itemsize)                 # out tile (double-buffered)
    if block_b is None:
        bb = max(16, (max(budget - fixed, 0) // per_row) // 16 * 16)
        bb = min(bb, 1024)
        block_b = min(bb, _round_up(B, 16))
        if B >= 64:
            # >= 2 grid steps so the parallel batch axis shards across both
            # TensorCores on v7x (single-TC chips just see a short pipeline).
            block_b = min(block_b, _round_up(pl.cdiv(B, 2), 16))
    # TODO(synk): K-/N-tiled fallback with an f32 VMEM accumulator for very large
    # d_in*d_out where the resident weights alone exceed the VMEM budget (v7x).

    B_pad = _round_up(B, block_b)
    if B_pad != B:
        # Zero rows -> y = bias -> finite LayerNorm stats; sliced off below.
        x = jnp.pad(x, ((0, B_pad - B), (0, 0)))
        z = jnp.pad(z, ((0, B_pad - B), (0, 0)))

    vmem_needed = (2 * 2 * block_b * d_in * in_itemsize            # x, z tiles
                   + 2 * (2 * d_in * n_pad * 2 + 8 * n_pad * 4)    # residents (worst case)
                   + 2 * block_b * n_pad * out_itemsize)           # out tile
    vmem_limit = int(min(budget, max(32 * 1024 * 1024, 2 * vmem_needed)))

    cost = pl.CostEstimate(
        flops=2 * 2 * B_pad * d_in * n_pad,                        # two matmuls
        transcendentals=2 * B_pad * n_pad,                         # softplus exp+log
        bytes_accessed=(2 * B_pad * d_in * in_itemsize
                        + 2 * d_in * n_pad * 2 + 8 * n_pad * 4
                        + B_pad * n_pad * out_itemsize),
    )

    def build(single_buffer_consts):
        const_kw = {"pipeline_mode": pl.Buffered(1)} if single_buffer_consts else {}
        in_specs = [
            pl.BlockSpec((block_b, d_in), lambda i: (i, 0)),       # x: tiled over batch
            pl.BlockSpec((block_b, d_in), lambda i: (i, 0)),       # z: tiled over batch
            pl.BlockSpec((d_in, n_pad), lambda i: (0, 0), **const_kw),  # W.T (resident)
            pl.BlockSpec((d_in, n_pad), lambda i: (0, 0), **const_kw),  # pos_w.T (resident)
            pl.BlockSpec((8, n_pad), lambda i: (0, 0), **const_kw),     # bias/gamma/beta
        ]
        return pl.pallas_call(
            partial(convex_layer_kernel, d_out=d_out),
            out_shape=jax.ShapeDtypeStruct((B_pad, n_pad), out_dtype),
            grid=(B_pad // block_b,),
            in_specs=in_specs,
            out_specs=pl.BlockSpec((block_b, n_pad), lambda i: (i, 0)),
            compiler_params=pltpu.CompilerParams(
                dimension_semantics=("parallel",),
                vmem_limit_bytes=vmem_limit,
            ),
            cost_estimate=cost,
        )

    try:
        out = build(True)(x, z, wx, wz, par)
    except Exception:
        # This JAX build rejects pl.Buffered(1) on constant blocks -> use the
        # default double-buffering (correctness identical, slightly more VMEM).
        out = build(False)(x, z, wx, wz, par)

    return out[:B, :d_out]


def convex_layer_forward(x, z, w, b, pos_weights, scale, gamma, beta, *,
                         block_b=None, out_dtype=jnp.float32):
    """Convenience wrapper: param prep + apply (prefer caching the prep in eval)."""
    wx, wz, par, d_out = prepare_convex_layer_params(w, b, pos_weights, scale,
                                                     gamma, beta)
    return convex_layer_apply(x, z, wx, wz, par, d_out, block_b=block_b,
                              out_dtype=out_dtype)


def _orthogonal(key, shape):
    """Deterministic orthogonal init (mirrors nn.init.orthogonal_)."""
    rows, cols = shape
    flat = jax.random.normal(key, (max(rows, cols), min(rows, cols)), jnp.float32)
    q, r = jnp.linalg.qr(flat)
    q = q * jnp.sign(jnp.diag(r))
    if rows < cols:
        q = q.T
    return q[:rows, :cols]


def _reference(x, z, w, b, pos_weights, scale, gamma, beta):
    y = x @ w.T + b
    pos_w = jax.nn.softplus(pos_weights + CFG_EPS)
    y = y + (z @ pos_w.T) * scale
    mean = y.mean(-1, keepdims=True)
    var = ((y - mean) ** 2).mean(-1, keepdims=True)
    y = (y - mean) / jnp.sqrt(var + LN_EPS) * gamma + beta
    return jax.nn.softplus(y)


if __name__ == "__main__":
    B, D_IN, D_OUT = 8, 32, 32

    key = jax.random.PRNGKey(0)
    k_x, k_z, k_w, k_b = jax.random.split(key, 4)

    x = jax.random.normal(k_x, (B, D_IN), jnp.float32)
    z = jax.random.normal(k_z, (B, D_IN), jnp.float32)

    # Parameters (deterministic, per module __init__)
    w = _orthogonal(k_w, (D_OUT, D_IN))                                # linear.weight
    bound = 1.0 / math.sqrt(D_IN)
    b = jax.random.uniform(k_b, (D_OUT,), jnp.float32, -bound, bound)  # linear.bias
    pos_weights = jnp.zeros((D_OUT, D_IN), jnp.float32)                # pos_weights
    scale = jnp.ones((1,), jnp.float32) * CFG_INIT_SCALE               # scale
    gamma = jnp.ones((D_OUT,), jnp.float32)                            # LayerNorm weight
    beta = jnp.zeros((D_OUT,), jnp.float32)                            # LayerNorm bias

    # Parameter prep once (eval mode) — reused across forward calls.
    wx, wz, par, d_out = prepare_convex_layer_params(w, b, pos_weights, scale,
                                                     gamma, beta)
    out = convex_layer_apply(x, z, wx, wz, par, d_out)
    out = jax.block_until_ready(out)

    ref = _reference(x, z, w, b, pos_weights, scale[0], gamma, beta)
    # bf16 matmul operands (f32 accumulation) => relax tolerance vs f32 reference.
    assert out.shape == ref.shape, "shape mismatch vs reference"
    assert jnp.allclose(out, ref, atol=3e-2, rtol=3e-2), "mismatch vs reference"

    print("KERNEL_OK")
</pallas_src>

<mosaic_0001>
module attributes {stable_mosaic.version = 11 : i64} {
  func.func @convex_layer_kernel(%arg0: i32, %arg1: memref<16x32xf32, #tpu.memory_space<vmem>>, %arg2: memref<16x32xf32, #tpu.memory_space<vmem>>, %arg3: memref<32x128xbf16, #tpu.memory_space<vmem>>, %arg4: memref<32x128xbf16, #tpu.memory_space<vmem>>, %arg5: memref<8x128xf32, #tpu.memory_space<vmem>>, %arg6: memref<16x128xf32, #tpu.memory_space<vmem>>) attributes {dimension_semantics = [#tpu.dimension_semantics<parallel>], iteration_bounds = array<i64: 1>, scalar_prefetch = 0 : i64, scratch_operands = 0 : i64, tpu.core_type = #tpu.core_type<tc>, window_params = [{transform_indices = @transform_0, window_bounds = array<i64: 16, 32>}, {transform_indices = @transform_1, window_bounds = array<i64: 16, 32>}, {pipeline_mode = #tpu.pipeline_mode<synchronous>, transform_indices = @transform_2, window_bounds = array<i64: 32, 128>}, {pipeline_mode = #tpu.pipeline_mode<synchronous>, transform_indices = @transform_3, window_bounds = array<i64: 32, 128>}, {pipeline_mode = #tpu.pipeline_mode<synchronous>, transform_indices = @transform_4, window_bounds = array<i64: 8, 128>}, {transform_indices = @transform_5, window_bounds = array<i64: 16, 128>}]} {
    %c0 = arith.constant 0 : index
    %c0_0 = arith.constant 0 : index
    %0 = vector.load %arg1[%c0, %c0_0] : memref<16x32xf32, #tpu.memory_space<vmem>>, vector<16x32xf32>
    %1 = arith.truncf %0 : vector<16x32xf32> to vector<16x32xbf16>
    %c0_1 = arith.constant 0 : index
    %c0_2 = arith.constant 0 : index
    %2 = vector.load %arg2[%c0_1, %c0_2] : memref<16x32xf32, #tpu.memory_space<vmem>>, vector<16x32xf32>
    %3 = arith.truncf %2 : vector<16x32xf32> to vector<16x32xbf16>
    %c0_3 = arith.constant 0 : index
    %c0_4 = arith.constant 0 : index
    %4 = vector.load %arg3[%c0_3, %c0_4] : memref<32x128xbf16, #tpu.memory_space<vmem>>, vector<32x128xbf16>
    %cst = arith.constant dense<0.000000e+00> : vector<16x128xf32>
    %5 = tpu.matmul %1, %4, %cst {dimension_numbers = #tpu.dot_dimension_numbers<[1], [0], [0], [1], [0, 0, 1, 1], [], []>} : vector<16x32xbf16>, vector<32x128xbf16>, vector<16x128xf32> -> vector<16x128xf32>
    %c0_5 = arith.constant 0 : index
    %c0_6 = arith.constant 0 : index
    %6 = vector.load %arg4[%c0_5, %c0_6] : memref<32x128xbf16, #tpu.memory_space<vmem>>, vector<32x128xbf16>
    %cst_7 = arith.constant dense<0.000000e+00> : vector<16x128xf32>
    %7 = tpu.matmul %3, %6, %cst_7 {dimension_numbers = #tpu.dot_dimension_numbers<[1], [0], [0], [1], [0, 0, 1, 1], [], []>} : vector<16x32xbf16>, vector<32x128xbf16>, vector<16x128xf32> -> vector<16x128xf32>
    %8 = arith.addf %5, %7 : vector<16x128xf32>
    %c0_8 = arith.constant 0 : index
    %c0_9 = arith.constant 0 : index
    %9 = vector.load %arg5[%c0_8, %c0_9] : memref<8x128xf32, #tpu.memory_space<vmem>>, vector<1x128xf32>
    %10 = vector.broadcast %9 : vector<1x128xf32> to vector<16x128xf32>
    %11 = arith.addf %8, %10 : vector<16x128xf32>
    %cst_10 = arith.constant dense<0.000000e+00> : vector<16xf32>
    %12 = vector.multi_reduction <add>, %11, %cst_10 [1] : vector<16x128xf32> to vector<16xf32>
    %13 = vector.shape_cast %12 : vector<16xf32> to vector<16x1xf32>
    %cst_11 = arith.constant 3.125000e-02 : f32
    %14 = vector.broadcast %cst_11 : f32 to vector<16x1xf32>
    %15 = arith.mulf %13, %14 : vector<16x1xf32>
    %16 = arith.mulf %11, %11 : vector<16x128xf32>
    %cst_12 = arith.constant dense<0.000000e+00> : vector<16xf32>
    %17 = vector.multi_reduction <add>, %16, %cst_12 [1] : vector<16x128xf32> to vector<16xf32>
    %18 = vector.shape_cast %17 : vector<16xf32> to vector<16x1xf32>
    %cst_13 = arith.constant 3.125000e-02 : f32
    %19 = vector.broadcast %cst_13 : f32 to vector<16x1xf32>
    %20 = arith.mulf %18, %19 : vector<16x1xf32>
    %21 = arith.mulf %15, %15 : vector<16x1xf32>
    %22 = arith.subf %20, %21 : vector<16x1xf32>
    %cst_14 = arith.constant 0.000000e+00 : f32
    %23 = vector.broadcast %cst_14 : f32 to vector<16x1xf32>
    %24 = arith.maximumf %22, %23 : vector<16x1xf32>
    %25 = vector.broadcast %15 : vector<16x1xf32> to vector<16x128xf32>
    %26 = arith.subf %11, %25 : vector<16x128xf32>
    %cst_15 = arith.constant 9.99999974E-6 : f32
    %27 = vector.broadcast %cst_15 : f32 to vector<16x1xf32>
    %28 = arith.addf %24, %27 : vector<16x1xf32>
    %29 = math.rsqrt %28 : vector<16x1xf32>
    %30 = vector.broadcast %29 : vector<16x1xf32> to vector<16x128xf32>
    %31 = arith.mulf %26, %30 : vector<16x128xf32>
    %c1 = arith.constant 1 : index
    %c0_16 = arith.constant 0 : index
    %32 = vector.load %arg5[%c1, %c0_16] : memref<8x128xf32, #tpu.memory_space<vmem>>, vector<1x128xf32>
    %33 = vector.broadcast %32 : vector<1x128xf32> to vector<16x128xf32>
    %34 = arith.mulf %31, %33 : vector<16x128xf32>
    %c2 = arith.constant 2 : index
    %c0_17 = arith.constant 0 : index
    %35 = vector.load %arg5[%c2, %c0_17] : memref<8x128xf32, #tpu.memory_space<vmem>>, vector<1x128xf32>
    %36 = vector.broadcast %35 : vector<1x128xf32> to vector<16x128xf32>
    %37 = arith.addf %34, %36 : vector<16x128xf32>
    %cst_18 = arith.constant 0.000000e+00 : f32
    %38 = vector.broadcast %cst_18 : f32 to vector<16x128xf32>
    %39 = arith.maximumf %37, %38 : vector<16x128xf32>
    %40 = vector.broadcast %cst_18 : f32 to vector<16x128xf32>
    %41 = arith.subf %37, %40 : vector<16x128xf32>
    %42 = arith.cmpf one, %41, %41 : vector<16x128xf32>
    %43 = vector.broadcast %cst_18 : f32 to vector<16x128xf32>
    %44 = arith.addf %37, %43 : vector<16x128xf32>
    %45 = math.absf %41 : vector<16x128xf32>
    %cst_19 = arith.constant 0.000000e+00 : f32
    %46 = vector.broadcast %cst_19 : f32 to vector<16x128xf32>
    %47 = arith.subf %46, %45 : vector<16x128xf32>
    %48 = math.exp %47 : vector<16x128xf32>
    %49 = math.log1p %48 : vector<16x128xf32>
    %50 = arith.addf %39, %49 : vector<16x128xf32>
    %51 = arith.select %42, %44, %50 : vector<16x128xi1>, vector<16x128xf32>
    %c0_20 = arith.constant 0 : index
    %c0_21 = arith.constant 0 : index
    %52 = vector.load %arg6[%c0_20, %c0_21] : memref<16x128xf32, #tpu.memory_space<vmem>>, vector<16x128xf32>
    tpu.vector_store %arg6[%c0_20, %c0_21], %51 {strides = array<i32>} : memref<16x128xf32, #tpu.memory_space<vmem>>, vector<16x128xf32>,
    return
  }
  func.func @transform_0(%arg0: i32) -> (i32, i32) {
    %c0_i32 = arith.constant 0 : i32
    %c0_i32_0 = arith.constant 0 : i32
    return %arg0, %c0_i32 : i32, i32
  }
  func.func @transform_1(%arg0: i32) -> (i32, i32) {
    %c0_i32 = arith.constant 0 : i32
    %c0_i32_0 = arith.constant 0 : i32
    return %arg0, %c0_i32 : i32, i32
  }
  func.func @transform_2(%arg0: i32) -> (i32, i32) {
    %c0_i32 = arith.constant 0 : i32
    %c0_i32_0 = arith.constant 0 : i32
    %c0_i32_1 = arith.constant 0 : i32
    return %c0_i32, %c0_i32_0 : i32, i32
  }
  func.func @transform_3(%arg0: i32) -> (i32, i32) {
    %c0_i32 = arith.constant 0 : i32
    %c0_i32_0 = arith.constant 0 : i32
    %c0_i32_1 = arith.constant 0 : i32
    return %c0_i32, %c0_i32_0 : i32, i32
  }
  func.func @transform_4(%arg0: i32) -> (i32, i32) {
    %c0_i32 = arith.constant 0 : i32
    %c0_i32_0 = arith.constant 0 : i32
    %c0_i32_1 = arith.constant 0 : i32
    return %c0_i32, %c0_i32_0 : i32, i32
  }
  func.func @transform_5(%arg0: i32) -> (i32, i32) {
    %c0_i32 = arith.constant 0 : i32
    %c0_i32_0 = arith.constant 0 : i32
    return %arg0, %c0_i32 : i32, i32
  }
}

module attributes {stable_mosaic.version = 11 : i64} {
  func.func @convex_layer_kernel(%arg0: i32, %arg1: memref<16x32xf32, #tpu.memory_space<vmem>>, %arg2: memref<16x32xf32, #tpu.memory_space<vmem>>, %arg3: memref<32x128xbf16, #tpu.memory_space<vmem>>, %arg4: memref<32x128xbf16, #tpu.memory_space<vmem>>, %arg5: memref<8x128xf32, #tpu.memory_space<vmem>>, %arg6: memref<16x128xf32, #tpu.memory_space<vmem>>) attributes {dimension_semantics = [#tpu.dimension_semantics<parallel>], iteration_bounds = array<i64: 1>, scalar_prefetch = 0 : i64, scratch_operands = 0 : i64, tpu.core_type = #tpu.core_type<tc>, window_params = [{transform_indices = @transform_0, window_bounds = array<i64: 16, 32>}, {transform_indices = @transform_1, window_bounds = array<i64: 16, 32>}, {pipeline_mode = #tpu.pipeline_mode<synchronous>, transform_indices = @transform_2, window_bounds = array<i64: 32, 128>}, {pipeline_mode = #tpu.pipeline_mode<synchronous>, transform_indices = @transform_3, window_bounds = array<i64: 32, 128>}, {pipeline_mode = #tpu.pipeline_mode<synchronous>, transform_indices = @transform_4, window_bounds = array<i64: 8, 128>}, {transform_indices = @transform_5, window_bounds = array<i64: 16, 128>}]} {
    %c0 = arith.constant 0 : index
    %c0_0 = arith.constant 0 : index
    %0 = vector.load %arg1[%c0, %c0_0] : memref<16x32xf32, #tpu.memory_space<vmem>>, vector<16x32xf32>
    %1 = arith.truncf %0 : vector<16x32xf32> to vector<16x32xbf16>
    %c0_1 = arith.constant 0 : index
    %c0_2 = arith.constant 0 : index
    %2 = vector.load %arg2[%c0_1, %c0_2] : memref<16x32xf32, #tpu.memory_space<vmem>>, vector<16x32xf32>
    %3 = arith.truncf %2 : vector<16x32xf32> to vector<16x32xbf16>
    %c0_3 = arith.constant 0 : index
    %c0_4 = arith.constant 0 : index
    %4 = vector.load %arg3[%c0_3, %c0_4] : memref<32x128xbf16, #tpu.memory_space<vmem>>, vector<32x128xbf16>
    %cst = arith.constant dense<0.000000e+00> : vector<16x128xf32>
    %5 = tpu.matmul %1, %4, %cst {dimension_numbers = #tpu.dot_dimension_numbers<[1], [0], [0], [1], [0, 0, 1, 1], [], []>} : vector<16x32xbf16>, vector<32x128xbf16>, vector<16x128xf32> -> vector<16x128xf32>
    %c0_5 = arith.constant 0 : index
    %c0_6 = arith.constant 0 : index
    %6 = vector.load %arg4[%c0_5, %c0_6] : memref<32x128xbf16, #tpu.memory_space<vmem>>, vector<32x128xbf16>
    %cst_7 = arith.constant dense<0.000000e+00> : vector<16x128xf32>
    %7 = tpu.matmul %3, %6, %cst_7 {dimension_numbers = #tpu.dot_dimension_numbers<[1], [0], [0], [1], [0, 0, 1, 1], [], []>} : vector<16x32xbf16>, vector<32x128xbf16>, vector<16x128xf32> -> vector<16x128xf32>
    %8 = arith.addf %5, %7 : vector<16x128xf32>
    %c0_8 = arith.constant 0 : index
    %c0_9 = arith.constant 0 : index
    %9 = vector.load %arg5[%c0_8, %c0_9] : memref<8x128xf32, #tpu.memory_space<vmem>>, vector<1x128xf32>
    %10 = vector.broadcast %9 : vector<1x128xf32> to vector<16x128xf32>
    %11 = arith.addf %8, %10 : vector<16x128xf32>
    %cst_10 = arith.constant dense<0.000000e+00> : vector<16xf32>
    %12 = vector.multi_reduction <add>, %11, %cst_10 [1] : vector<16x128xf32> to vector<16xf32>
    %13 = vector.shape_cast %12 : vector<16xf32> to vector<16x1xf32>
    %cst_11 = arith.constant 3.125000e-02 : f32
    %14 = vector.broadcast %cst_11 : f32 to vector<16x1xf32>
    %15 = arith.mulf %13, %14 : vector<16x1xf32>
    %16 = arith.mulf %11, %11 : vector<16x128xf32>
    %cst_12 = arith.constant dense<0.000000e+00> : vector<16xf32>
    %17 = vector.multi_reduction <add>, %16, %cst_12 [1] : vector<16x128xf32> to vector<16xf32>
    %18 = vector.shape_cast %17 : vector<16xf32> to vector<16x1xf32>
    %cst_13 = arith.constant 3.125000e-02 : f32
    %19 = vector.broadcast %cst_13 : f32 to vector<16x1xf32>
    %20 = arith.mulf %18, %19 : vector<16x1xf32>
    %21 = arith.mulf %15, %15 : vector<16x1xf32>
    %22 = arith.subf %20, %21 : vector<16x1xf32>
    %cst_14 = arith.constant 0.000000e+00 : f32
    %23 = vector.broadcast %cst_14 : f32 to vector<16x1xf32>
    %24 = arith.maximumf %22, %23 : vector<16x1xf32>
    %25 = vector.broadcast %15 : vector<16x1xf32> to vector<16x128xf32>
    %26 = arith.subf %11, %25 : vector<16x128xf32>
    %cst_15 = arith.constant 9.99999974E-6 : f32
    %27 = vector.broadcast %cst_15 : f32 to vector<16x1xf32>
    %28 = arith.addf %24, %27 : vector<16x1xf32>
    %29 = math.rsqrt %28 : vector<16x1xf32>
    %30 = vector.broadcast %29 : vector<16x1xf32> to vector<16x128xf32>
    %31 = arith.mulf %26, %30 : vector<16x128xf32>
    %c1 = arith.constant 1 : index
    %c0_16 = arith.constant 0 : index
    %32 = vector.load %arg5[%c1, %c0_16] : memref<8x128xf32, #tpu.memory_space<vmem>>, vector<1x128xf32>
    %33 = vector.broadcast %32 : vector<1x128xf32> to vector<16x128xf32>
    %34 = arith.mulf %31, %33 : vector<16x128xf32>
    %c2 = arith.constant 2 : index
    %c0_17 = arith.constant 0 : index
    %35 = vector.load %arg5[%c2, %c0_17] : memref<8x128xf32, #tpu.memory_space<vmem>>, vector<1x128xf32>
    %36 = vector.broadcast %35 : vector<1x128xf32> to vector<16x128xf32>
    %37 = arith.addf %34, %36 : vector<16x128xf32>
    %cst_18 = arith.constant 0.000000e+00 : f32
    %38 = vector.broadcast %cst_18 : f32 to vector<16x128xf32>
    %39 = arith.maximumf %37, %38 : vector<16x128xf32>
    %40 = vector.broadcast %cst_18 : f32 to vector<16x128xf32>
    %41 = arith.subf %37, %40 : vector<16x128xf32>
    %42 = arith.cmpf one, %41, %41 : vector<16x128xf32>
    %43 = vector.broadcast %cst_18 : f32 to vector<16x128xf32>
    %44 = arith.addf %37, %43 : vector<16x128xf32>
    %45 = math.absf %41 : vector<16x128xf32>
    %cst_19 = arith.constant 0.000000e+00 : f32
    %46 = vector.broadcast %cst_19 : f32 to vector<16x128xf32>
    %47 = arith.subf %46, %45 : vector<16x128xf32>
    %48 = math.exp %47 : vector<16x128xf32>
    %49 = math.log1p %48 : vector<16x128xf32>
    %50 = arith.addf %39, %49 : vector<16x128xf32>
    %51 = arith.select %42, %44, %50 : vector<16x128xi1>, vector<16x128xf32>
    %c0_20 = arith.constant 0 : index
    %c0_21 = arith.constant 0 : index
    %52 = vector.load %arg6[%c0_20, %c0_21] : memref<16x128xf32, #tpu.memory_space<vmem>>, vector<16x128xf32>
    tpu.vector_store %arg6[%c0_20, %c0_21], %51 {strides = array<i32>} : memref<16x128xf32, #tpu.memory_space<vmem>>, vector<16x128xf32>,
    return
  }
  func.func @transform_0(%arg0: i32) -> (i32, i32) {
    %c0_i32 = arith.constant 0 : i32
    %c0_i32_0 = arith.constant 0 : i32
    return %arg0, %c0_i32 : i32, i32
  }
  func.func @transform_1(%arg0: i32) -> (i32, i32) {
    %c0_i32 = arith.constant 0 : i32
    %c0_i32_0 = arith.constant 0 : i32
    return %arg0, %c0_i32 : i32, i32
  }
  func.func @transform_2(%arg0: i32) -> (i32, i32) {
    %c0_i32 = arith.constant 0 : i32
    %c0_i32_0 = arith.constant 0 : i32
    %c0_i32_1 = arith.constant 0 : i32
    return %c0_i32, %c0_i32_0 : i32, i32
  }
  func.func @transform_3(%arg0: i32) -> (i32, i32) {
    %c0_i32 = arith.constant 0 : i32
    %c0_i32_0 = arith.constant 0 : i32
    %c0_i32_1 = arith.constant 0 : i32
    return %c0_i32, %c0_i32_0 : i32, i32
  }
  func.func @transform_4(%arg0: i32) -> (i32, i32) {
    %c0_i32 = arith.constant 0 : i32
    %c0_i32_0 = arith.constant 0 : i32
    %c0_i32_1 = arith.constant 0 : i32
    return %c0_i32, %c0_i32_0 : i32, i32
  }
  func.func @transform_5(%arg0: i32) -> (i32, i32) {
    %c0_i32 = arith.constant 0 : i32
    %c0_i32_0 = arith.constant 0 : i32
    return %arg0, %c0_i32 : i32, i32
  }
}

</mosaic_0001>

<bundles_post_ra>
// kernel: tpu_custom_call.1
= control target key start
LH: loop header
LB: loop body
LE: loop exit
PB: predicated region body
PF: predicated region fallthrough
CT: control target
= control target key end

     0   :  { %10 = vsyncpa [#allocation3], 0  ;;  %s577_s0 = inlined_call_operand.hbm [shape: f32[16,32], index: 0, kind: input, shape index: {}]   ;;  %s578_s1 = inlined_call_operand.hbm [shape: f32[16,32], index: 1, kind: input, shape index: {}]   ;;  %s579_s2 = inlined_call_operand.hbm [shape: bf16[32,128], index: 2, kind: input, shape index: {}]   ;;  %s580_s3 = inlined_call_operand.hbm [shape: bf16[32,128], index: 3, kind: input, shape index: {}]   ;;  %s581_s4 = inlined_call_operand.hbm [shape: f32[8,128], index: 4, kind: input, shape index: {}]   ;;  %s582_s5 = inlined_call_operand.hbm [shape: f32[16,128], index: 5, kind: output, shape index: {}]  }
   0x1   :  { %11 = vsyncpa [#allocation6], 0 }
   0x2   :  { %12 = vsyncpa [#allocation9], 0 }
   0x3   :  { %13 = vsyncpa [#allocation4], 0  ;;  %s508_s18 = smov [#allocation5]  }
   0x4   :  { %s31_s19 = sshll.u32 %s508_s18, 4  ;;  %s32_s19 = int_to_ptr.vmem [resolvable:$true] %s31_s19 }
   0x5   :  { %s388_s20 = scalar_lea.vmem %s32_s19, 256  ;;  %p393_p1 = scmp.lt.s32.totalorder %s32_s19, %s32_s19 }
   0x6   :  { %p389_p0 = scmp.ne.s32.totalorder %s32_s19, %s388_s20  ;;  %p394_p2 = scmp.lt.s32.totalorder %s388_s20, %s388_s20 }
   0x8   :  { %p395_p3 = por %p394_p2, %p393_p1 }
   0xa   :  { %p396_p4 = pnand %p395_p3, %p389_p0 }
   0xc   :  { %399 = shalt.err (!%p396_p4)
}
   0xd   :  { %s509_s21 = smov 128   ;;  %s510_s22 = smov 8  }
   0xe   :  { %37 = dma.hbm_to_vmem [thread:$0]  %s578_s1, 256, %s32_s19, [#allocation6], %s509_s21, %s509_s21, %s510_s22  }
   0xf   :  { %s511_s25 = smov [#allocation8]   ;;  %s512_s27 = smov [#allocation2]  }
  0x10   :  { %s55_s26 = sshll.u32 %s511_s25, 4  ;;  %s19_s28 = sshll.u32 %s512_s27, 4  ;;  %s56_s26 = int_to_ptr.vmem [resolvable:$true] %s55_s26  ;;  %s20_s28 = int_to_ptr.vmem [resolvable:$true] %s19_s28 }
  0x11   :  { %s408_s29 = scalar_lea.vmem %s56_s26, 256  ;;  %p413_p6 = scmp.lt.s32.totalorder %s56_s26, %s56_s26 }
  0x12   :  { %p409_p5 = scmp.ne.s32.totalorder %s56_s26, %s408_s29  ;;  %p414_p7 = scmp.lt.s32.totalorder %s408_s29, %s408_s29 }
  0x14   :  { %p415_p8 = por %p414_p7, %p413_p6 }
  0x16   :  { %p416_p9 = pnand %p415_p8, %p409_p5 }
  0x18   :  { %419 = shalt.err (!%p416_p9)
}
  0x19   :  { %s513_s30 = smov 64   ;;  %s514_s6 = smov 4  }
  0x1a   :  { %61 = dma.hbm_to_vmem [thread:$0]  %s580_s3, 256, %s56_s26, [#allocation9], %s513_s30, %s513_s30, %s514_s6  }
  0x1b   :  { %s428_s1 = scalar_lea.vmem %s20_s28, 256  ;;  %p433_p11 = scmp.lt.s32.totalorder %s20_s28, %s20_s28 }
  0x1c   :  { %p429_p10 = scmp.ne.s32.totalorder %s20_s28, %s428_s1  ;;  %p434_p12 = scmp.lt.s32.totalorder %s428_s1, %s428_s1 }
  0x1e   :  { %p435_p13 = por %p434_p12, %p433_p11 }
  0x20   :  { %p436_p0 = pnand %p435_p13, %p429_p10 }
  0x22   :  { %439 = shalt.err (!%p436_p0)
}
  0x23   :  { %25 = dma.hbm_to_vmem [thread:$0]  %s577_s0, 256, %s20_s28, [#allocation3], %s509_s21, %s509_s21, %s510_s22  }
  0x24   :  { %s515_s11 = smov [#allocation7]   ;;  %s516_s13 = smov [#allocation10]  }
  0x25   :  { %s43_s12 = sshll.u32 %s515_s11, 4  ;;  %s68_s3 = sshll.u32 %s516_s13, 4  ;;  %s44_s12 = int_to_ptr.vmem [resolvable:$true] %s43_s12  ;;  %s69_s3 = int_to_ptr.vmem [resolvable:$true] %s68_s3 }
  0x26   :  { %s448_s14 = scalar_lea.vmem %s44_s12, 256  ;;  %p453_p2 = scmp.lt.s32.totalorder %s44_s12, %s44_s12 }
  0x27   :  { %p449_p1 = scmp.ne.s32.totalorder %s44_s12, %s448_s14  ;;  %p454_p3 = scmp.lt.s32.totalorder %s448_s14, %s448_s14 }
  0x29   :  { %p455_p4 = por %p454_p3, %p453_p2 }
  0x2b   :  { %p456_p5 = pnand %p455_p4, %p449_p1 }
  0x2d   :  { %459 = shalt.err (!%p456_p5)
}
  0x2e   :  { %49 = dma.hbm_to_vmem [thread:$0]  %s579_s2, 256, %s44_s12, [#allocation6], %s513_s30, %s513_s30, %s514_s6  }
  0x2f   :  { %s468_s17 = scalar_lea.vmem %s69_s3, 128  ;;  %p473_p7 = scmp.lt.s32.totalorder %s69_s3, %s69_s3 }
  0x30   :  { %p469_p6 = scmp.ne.s32.totalorder %s69_s3, %s468_s17  ;;  %p474_p8 = scmp.lt.s32.totalorder %s468_s17, %s468_s17 }
  0x32   :  { %p475_p9 = por %p474_p8, %p473_p7 }
  0x34   :  { %p476_p10 = pnand %p475_p9, %p469_p6 }
  0x36   :  { %479 = shalt.err (!%p476_p10)
}
  0x37   :  { %71 = dma.hbm_to_vmem [thread:$0]  %s581_s4, 128, %s69_s3, [#allocation9]  }
  0x38   :  { %500 = dma.done.wait [#allocation3], 256  }
  0x39   :  { %501 = vsyncadd [#allocation3], 4294967040 }
  0x3a   :  { %502 = dma.done.wait [#allocation6], 512  }
  0x3b   :  { %503 = vsyncadd [#allocation6], 4294966784 }
  0x3c   :  { %504 = dma.done.wait [#allocation9], 384  }
  0x3d   :  { %505 = vsyncadd [#allocation9], 4294966912  ;;  %v517_v0 = vmov 0.0   ;;  %vm518_vm0 = vmmov 0   ;;  %v364_v1 = vld [vmem:[#allocation8 + $0x8] sm:$0xff]   ;;  %v365_v2 = vld [vmem:[#allocation7 + $0x8] sm:$0xff]  }
  0x3e   :  { %336 = vmatprep.subr.bf16.mxu0 %v517_v0  ;;  %344 = vmatprep.subr.bf16.mxu1 %v517_v0  ;;  %v366_v3 = vld [vmem:[#allocation8] sm:$0xff]   ;;  %v367_v4 = vld [vmem:[#allocation7] sm:$0xff]   ;;  %v92_v6 = vld [vmem:[#allocation5 + $0x8] sm:$0xff]  ;;  %vm114_vm1 = vcmask 261120   ;;  %s519_s2 = smov [#allocation11]  }
  0x3f   :  { %340 = vmatprep.mubr.msk.bf16.mxu0 %vm518_vm0, %v517_v0  ;;  %348 = vmatprep.mubr.msk.bf16.mxu1 %vm518_vm0, %v517_v0  ;;  %v91_v5 = vld [vmem:[#allocation5] sm:$0xff]  ;;  %v88_v7 = vld [vmem:[#allocation2] sm:$0xff]  ;;  %v89_v9 = vld [vmem:[#allocation2 + $0x8] sm:$0xff]  ;;  %s307_s4 = sshll.u32 %s519_s2, 4  ;;  %s308_s4 = int_to_ptr.vmem [resolvable:$true] %s307_s4 }
  0x40   :  { %337 = vmatpush3.bf16.msra.mxu0 %v364_v1  ;;  %345 = vmatpush3.bf16.msra.mxu1 %v365_v2  ;;  %v93_v8 = vpack.c.bf16 %v92_v6, %v91_v5  ;;  %v90_v10 = vpack.c.bf16 %v89_v9, %v88_v7  ;;  %v327_v13 = vld [vmem:[#allocation10] ss:$0 sm:$0xff]  ;;  %v328_v44 = vld [vmem:[#allocation10 + $0x1] ss:$0 sm:$0xff]  ;;  %v329_v46 = vld [vmem:[#allocation10 + $0x2] ss:$0 sm:$0xff]  ;;  %p485_p12 = scmp.lt.s32.totalorder %s308_s4, %s308_s4 }
  0x41   :  { %338 = vmatprep.subr.bf16.mxu0 %v517_v0  ;;  %346 = vmatprep.subr.bf16.mxu1 %v517_v0  ;;  %s480_s19 = scalar_lea.vmem %s308_s4, 256 }
  0x42   :  { %p481_p11 = scmp.ne.s32.totalorder %s308_s4, %s480_s19  ;;  %p486_p13 = scmp.lt.s32.totalorder %s480_s19, %s480_s19 }
  0x44   :  { %339 = vmatpush3.bf16.msra.mxu0 %v366_v3  ;;  %347 = vmatpush3.bf16.msra.mxu1 %v367_v4  ;;  %p487_p0 = por %p486_p13, %p485_p12 }
  0x46   :  { %p488_p1 = pnand %p487_p0, %p481_p11 }
  0x47   :  { %341 = vmatmul.mubr.msk.bf16.vlgmr.msra.gmra.mxu0 %vm114_vm1, %v93_v8  ;;  %349 = vmatmul.mubr.msk.bf16.vlgmr.msra.gmra.mxu1 %vm114_vm1, %v90_v10 }
 0x107   :  { %v152_v11 = vpop.f32.mrf.mxu0  ;;  %v208_v12 = vpop.f32.mrf.mxu1 }
 0x108   :  { %v209_v14 = vadd.f32 %v208_v12, %v152_v11 }
 0x109   :  { %v342_v15 = vpop.f32.mrf.mxu0  ;;  %v350_v16 = vpop.f32.mrf.mxu1 }
 0x10a   :  { %v220_v17 = vadd.f32 %v327_v13, %v209_v14 }
 0x10b   :  { %v155_v18 = vpop.f32.mrf.mxu0  ;;  %v211_v19 = vpop.f32.mrf.mxu1 }
 0x10c   :  { %v212_v20 = vadd.f32 %v211_v19, %v155_v18  ;;  %222 = vadd.xlane.f32.xlu0 %v220_v17  ;;  %v228_v22 = vmul.f32 %v220_v17, %v220_v17 }
 0x10d   :  { %v343_v21 = vpop.f32.mrf.mxu0  ;;  %v351_v23 = vpop.f32.mrf.mxu1 }
 0x10e   :  { %v221_v24 = vadd.f32 %v327_v13, %v212_v20  ;;  %230 = vadd.xlane.f32.xlu1 %v228_v22 }
 0x110   :  { %224 = vadd.xlane.f32.xlu0 %v221_v24  ;;  %v229_v25 = vmul.f32 %v221_v24, %v221_v24 }
 0x112   :  { %232 = vadd.xlane.f32.xlu1 %v229_v25 }
 0x195   :  { %v223_v26 = vpop.xlane.xlu0 %222 }
 0x196   :  { %v226_v27 = vmul.f32 0.03125, %v223_v26 }
 0x197   :  { %v231_v28 = vpop.xlane.xlu1 %230 }
 0x198   :  { %v236_v29 = vmul.f32 %v226_v27, %v226_v27  ;;  %v234_v30 = vmul.f32 0.03125, %v231_v28  ;;  %v242_v42 = vsub.f32 %v220_v17, %v226_v27 }
 0x199   :  { %v225_v31 = vpop.xlane.xlu0 %224 }
 0x19a   :  { %v238_v32 = vsub.f32 %v234_v30, %v236_v29  ;;  %v227_v33 = vmul.f32 0.03125, %v225_v31 }
 0x19b   :  { %v233_v34 = vpop.xlane.xlu1 %232 }
 0x19c   :  { %v240_v35 = vmax.f32 %v238_v32, 0.0  ;;  %v237_v36 = vmul.f32 %v227_v33, %v227_v33  ;;  %v235_v37 = vmul.f32 0.03125, %v233_v34  ;;  %v243_v47 = vsub.f32 %v221_v24, %v227_v33 }
 0x19e   :  { %v244_v38 = vadd.f32 1e-05, %v240_v35  ;;  %v239_v39 = vsub.f32 %v235_v37, %v237_v36 }
 0x1a0   :  { %368 = vrsqrt.f32 %v244_v38  ;;  %v241_v40 = vmax.f32 %v239_v39, 0.0 }
 0x1a2   :  { %v245_v41 = vadd.f32 1e-05, %v241_v40 }
 0x1a4   :  { %370 = vrsqrt.f32 %v245_v41 }
 0x1ad   :  { %v369_v43 = vpop.eup %368 }
 0x1ae   :  { %v248_v45 = vmul.f32 %v369_v43, %v242_v42 }
 0x1b0   :  { %v255_v48 = vmul.f32 %v328_v44, %v248_v45 }
 0x1b1   :  { %v371_v49 = vpop.eup %370 }
 0x1b2   :  { %v249_v50 = vmul.f32 %v371_v49, %v243_v47  ;;  %v262_v51 = vadd.f32 %v329_v46, %v255_v48 }
 0x1b4   :  { %v256_v52 = vmul.f32 %v328_v44, %v249_v50  ;;  %v270_v53 = vand.u32 2147483647, %v262_v51  ;;  %v264_v8 = vmax.f32 %v262_v51, 0.0  ;;  %vm266_vm3 = vcmp.ne.f32.partialorder %v262_v51, %v262_v51 }
 0x1b6   :  { %v263_v54 = vadd.f32 %v329_v46, %v256_v52  ;;  %v272_v55 = vsub.f32 0.0, %v270_v53 }
 0x1b8   :  { %v271_v56 = vand.u32 2147483647, %v263_v54  ;;  %v274_v57 = vmul.f32 1.442695, %v272_v55  ;;  %v265_v15 = vmax.f32 %v263_v54, 0.0  ;;  %vm267_vm5 = vcmp.ne.f32.partialorder %v263_v54, %v263_v54 }
 0x1ba   :  { %v273_v58 = vsub.f32 0.0, %v271_v56  ;;  %372 = vpow2.f32 %v274_v57 }
 0x1bc   :  { %v276_v59 = vmul.f32 1.442695, %v273_v58 }
 0x1be   :  { %374 = vpow2.f32 %v276_v59 }
 0x1c7   :  { %v373_v60 = vpop.eup %372 }
 0x1c8   :  { %v278_v61 = vadd.f32 1.0, %v373_v60  ;;  %v281_v0 = vmul.f32 -0.5, %v373_v60  ;;  %v284_v3 = vand.u32 2147483647, %v373_v60 }
 0x1ca   :  { %376 = vlog2.f32 %v278_v61  ;;  %v282_v1 = vadd.f32 1.0, %v281_v0  ;;  %vm285_vm2 = vcmp.lt.f32.partialorder %v284_v3, 0.0004427343 }
 0x1cb   :  { %v375_v62 = vpop.eup %374 }
 0x1cc   :  { %v287_v63 = vadd.f32 1.0, %v375_v62  ;;  %v290_v2 = vmul.f32 -0.5, %v375_v62  ;;  %v283_v6 = vmul.f32 %v373_v60, %v282_v1  ;;  %v293_v9 = vand.u32 2147483647, %v375_v62 }
 0x1ce   :  { %378 = vlog2.f32 %v287_v63  ;;  %v291_v7 = vadd.f32 1.0, %v290_v2  ;;  %vm294_vm4 = vcmp.lt.f32.partialorder %v293_v9, 0.0004427343 }
 0x1d0   :  { %v292_v14 = vmul.f32 %v375_v62, %v291_v7 }
 0x1d7   :  { %v377_v4 = vpop.eup %376 }
 0x1d8   :  { %v280_v5 = vmul.f32 0.6931472, %v377_v4 }
 0x1da   :  { %v286_v10 = vsel %vm285_vm2, %v283_v6, %v280_v5 }
 0x1db   :  { %v379_v11 = vpop.eup %378  ;;  %v296_v12 = vadd.f32 %v286_v10, %v264_v8 }
 0x1dc   :  { %v289_v13 = vmul.f32 0.6931472, %v379_v11 }
 0x1dd   :  { %v298_v16 = vsel %vm266_vm3, %v262_v51, %v296_v12 }
 0x1de   :  { %v295_v17 = vsel %vm294_vm4, %v292_v14, %v289_v13  ;;  %300 = vst [vmem:[#allocation11] sm:$0xff] %v298_v16 }
 0x1df   :  { %v297_v18 = vadd.f32 %v295_v17, %v265_v15 }
 0x1e1   :  { %v299_v19 = vsel %vm267_vm5, %v263_v54, %v297_v18 }
 0x1e2   :  { %301 = vst [vmem:[#allocation11 + $0x8] sm:$0xff] %v299_v19 }
 0x1e3   :  { %491 = shalt.err (!%p488_p1)
}
 0x1e4   :  { %313 = dma.vmem_to_hbm [thread:$0]  %s308_s4, 256, %s582_s5, [#allocation4], %s509_s21, %s509_s21, %s510_s22  }
 0x1e5   :  { %506 = dma.done.wait [#allocation4], 256  }
 0x1e6   :  { %507 = vsyncadd [#allocation4], 4294967040 }
 0x1e7   :  { %317 = vsyncpa [#allocation3], 1 }
 0x1e8   :  { %318 = vsyncpa [#allocation6], 1 }
 0x1e9   :  { %319 = vsyncpa [#allocation9], 1 }
 0x1ea   :  { %320 = vsyncpa [#allocation4], 1 }

// kernel: tpu_custom_call.1
= control target key start
LH: loop header
LB: loop body
LE: loop exit
PB: predicated region body
PF: predicated region fallthrough
CT: control target
= control target key end

     0   :  { %10 = vsyncpa [#allocation3], 0  ;;  %s577_s0 = inlined_call_operand.hbm [shape: f32[16,32], index: 0, kind: input, shape index: {}]   ;;  %s578_s1 = inlined_call_operand.hbm [shape: f32[16,32], index: 1, kind: input, shape index: {}]   ;;  %s579_s2 = inlined_call_operand.hbm [shape: bf16[32,128], index: 2, kind: input, shape index: {}]   ;;  %s580_s3 = inlined_call_operand.hbm [shape: bf16[32,128], index: 3, kind: input, shape index: {}]   ;;  %s581_s4 = inlined_call_operand.hbm [shape: f32[8,128], index: 4, kind: input, shape index: {}]   ;;  %s582_s5 = inlined_call_operand.hbm [shape: f32[16,128], index: 5, kind: output, shape index: {}]  }
   0x1   :  { %11 = vsyncpa [#allocation6], 0 }
   0x2   :  { %12 = vsyncpa [#allocation9], 0 }
   0x3   :  { %13 = vsyncpa [#allocation4], 0  ;;  %s508_s18 = smov [#allocation5]  }
   0x4   :  { %s31_s19 = sshll.u32 %s508_s18, 4  ;;  %s32_s19 = int_to_ptr.vmem [resolvable:$true] %s31_s19 }
   0x5   :  { %s388_s20 = scalar_lea.vmem %s32_s19, 256  ;;  %p393_p1 = scmp.lt.s32.totalorder %s32_s19, %s32_s19 }
   0x6   :  { %p389_p0 = scmp.ne.s32.totalorder %s32_s19, %s388_s20  ;;  %p394_p2 = scmp.lt.s32.totalorder %s388_s20, %s388_s20 }
   0x8   :  { %p395_p3 = por %p394_p2, %p393_p1 }
   0xa   :  { %p396_p4 = pnand %p395_p3, %p389_p0 }
   0xc   :  { %399 = shalt.err (!%p396_p4)
}
   0xd   :  { %s509_s21 = smov 128   ;;  %s510_s22 = smov 8  }
   0xe   :  { %37 = dma.hbm_to_vmem [thread:$0]  %s578_s1, 256, %s32_s19, [#allocation6], %s509_s21, %s509_s21, %s510_s22  }
   0xf   :  { %s511_s25 = smov [#allocation8]   ;;  %s512_s27 = smov [#allocation2]  }
  0x10   :  { %s55_s26 = sshll.u32 %s511_s25, 4  ;;  %s19_s28 = sshll.u32 %s512_s27, 4  ;;  %s56_s26 = int_to_ptr.vmem [resolvable:$true] %s55_s26  ;;  %s20_s28 = int_to_ptr.vmem [resolvable:$true] %s19_s28 }
  0x11   :  { %s408_s29 = scalar_lea.vmem %s56_s26, 256  ;;  %p413_p6 = scmp.lt.s32.totalorder %s56_s26, %s56_s26 }
  0x12   :  { %p409_p5 = scmp.ne.s32.totalorder %s56_s26, %s408_s29  ;;  %p414_p7 = scmp.lt.s32.totalorder %s408_s29, %s408_s29 }
  0x14   :  { %p415_p8 = por %p414_p7, %p413_p6 }
  0x16   :  { %p416_p9 = pnand %p415_p8, %p409_p5 }
  0x18   :  { %419 = shalt.err (!%p416_p9)
}
  0x19   :  { %s513_s30 = smov 64   ;;  %s514_s6 = smov 4  }
  0x1a   :  { %61 = dma.hbm_to_vmem [thread:$0]  %s580_s3, 256, %s56_s26, [#allocation9], %s513_s30, %s513_s30, %s514_s6  }
  0x1b   :  { %s428_s1 = scalar_lea.vmem %s20_s28, 256  ;;  %p433_p11 = scmp.lt.s32.totalorder %s20_s28, %s20_s28 }
  0x1c   :  { %p429_p10 = scmp.ne.s32.totalorder %s20_s28, %s428_s1  ;;  %p434_p12 = scmp.lt.s32.totalorder %s428_s1, %s428_s1 }
  0x1e   :  { %p435_p13 = por %p434_p12, %p433_p11 }
  0x20   :  { %p436_p0 = pnand %p435_p13, %p429_p10 }
  0x22   :  { %439 = shalt.err (!%p436_p0)
}
  0x23   :  { %25 = dma.hbm_to_vmem [thread:$0]  %s577_s0, 256, %s20_s28, [#allocation3], %s509_s21, %s509_s21, %s510_s22  }
  0x24   :  { %s515_s11 = smov [#allocation7]   ;;  %s516_s13 = smov [#allocation10]  }
  0x25   :  { %s43_s12 = sshll.u32 %s515_s11, 4  ;;  %s68_s3 = sshll.u32 %s516_s13, 4  ;;  %s44_s12 = int_to_ptr.vmem [resolvable:$true] %s43_s12  ;;  %s69_s3 = int_to_ptr.vmem [resolvable:$true] %s68_s3 }
  0x26   :  { %s448_s14 = scalar_lea.vmem %s44_s12, 256  ;;  %p453_p2 = scmp.lt.s32.totalorder %s44_s12, %s44_s12 }
  0x27   :  { %p449_p1 = scmp.ne.s32.totalorder %s44_s12, %s448_s14  ;;  %p454_p3 = scmp.lt.s32.totalorder %s448_s14, %s448_s14 }
  0x29   :  { %p455_p4 = por %p454_p3, %p453_p2 }
  0x2b   :  { %p456_p5 = pnand %p455_p4, %p449_p1 }
  0x2d   :  { %459 = shalt.err (!%p456_p5)
}
  0x2e   :  { %49 = dma.hbm_to_vmem [thread:$0]  %s579_s2, 256, %s44_s12, [#allocation6], %s513_s30, %s513_s30, %s514_s6  }
  0x2f   :  { %s468_s17 = scalar_lea.vmem %s69_s3, 128  ;;  %p473_p7 = scmp.lt.s32.totalorder %s69_s3, %s69_s3 }
  0x30   :  { %p469_p6 = scmp.ne.s32.totalorder %s69_s3, %s468_s17  ;;  %p474_p8 = scmp.lt.s32.totalorder %s468_s17, %s468_s17 }
  0x32   :  { %p475_p9 = por %p474_p8, %p473_p7 }
  0x34   :  { %p476_p10 = pnand %p475_p9, %p469_p6 }
  0x36   :  { %479 = shalt.err (!%p476_p10)
}
  0x37   :  { %71 = dma.hbm_to_vmem [thread:$0]  %s581_s4, 128, %s69_s3, [#allocation9]  }
  0x38   :  { %500 = dma.done.wait [#allocation3], 256  }
  0x39   :  { %501 = vsyncadd [#allocation3], 4294967040 }
  0x3a   :  { %502 = dma.done.wait [#allocation6], 512  }
  0x3b   :  { %503 = vsyncadd [#allocation6], 4294966784 }
  0x3c   :  { %504 = dma.done.wait [#allocation9], 384  }
  0x3d   :  { %505 = vsyncadd [#allocation9], 4294966912  ;;  %v517_v0 = vmov 0.0   ;;  %vm518_vm0 = vmmov 0   ;;  %v364_v1 = vld [vmem:[#allocation8 + $0x8] sm:$0xff]   ;;  %v365_v2 = vld [vmem:[#allocation7 + $0x8] sm:$0xff]  }
  0x3e   :  { %336 = vmatprep.subr.bf16.mxu0 %v517_v0  ;;  %344 = vmatprep.subr.bf16.mxu1 %v517_v0  ;;  %v366_v3 = vld [vmem:[#allocation8] sm:$0xff]   ;;  %v367_v4 = vld [vmem:[#allocation7] sm:$0xff]   ;;  %v92_v6 = vld [vmem:[#allocation5 + $0x8] sm:$0xff]  ;;  %vm114_vm1 = vcmask 261120   ;;  %s519_s2 = smov [#allocation11]  }
  0x3f   :  { %340 = vmatprep.mubr.msk.bf16.mxu0 %vm518_vm0, %v517_v0  ;;  %348 = vmatprep.mubr.msk.bf16.mxu1 %vm518_vm0, %v517_v0  ;;  %v91_v5 = vld [vmem:[#allocation5] sm:$0xff]  ;;  %v88_v7 = vld [vmem:[#allocation2] sm:$0xff]  ;;  %v89_v9 = vld [vmem:[#allocation2 + $0x8] sm:$0xff]  ;;  %s307_s4 = sshll.u32 %s519_s2, 4  ;;  %s308_s4 = int_to_ptr.vmem [resolvable:$true] %s307_s4 }
  0x40   :  { %337 = vmatpush3.bf16.msra.mxu0 %v364_v1  ;;  %345 = vmatpush3.bf16.msra.mxu1 %v365_v2  ;;  %v93_v8 = vpack.c.bf16 %v92_v6, %v91_v5  ;;  %v90_v10 = vpack.c.bf16 %v89_v9, %v88_v7  ;;  %v327_v13 = vld [vmem:[#allocation10] ss:$0 sm:$0xff]  ;;  %v328_v44 = vld [vmem:[#allocation10 + $0x1] ss:$0 sm:$0xff]  ;;  %v329_v46 = vld [vmem:[#allocation10 + $0x2] ss:$0 sm:$0xff]  ;;  %p485_p12 = scmp.lt.s32.totalorder %s308_s4, %s308_s4 }
  0x41   :  { %338 = vmatprep.subr.bf16.mxu0 %v517_v0  ;;  %346 = vmatprep.subr.bf16.mxu1 %v517_v0  ;;  %s480_s19 = scalar_lea.vmem %s308_s4, 256 }
  0x42   :  { %p481_p11 = scmp.ne.s32.totalorder %s308_s4, %s480_s19  ;;  %p486_p13 = scmp.lt.s32.totalorder %s480_s19, %s480_s19 }
  0x44   :  { %339 = vmatpush3.bf16.msra.mxu0 %v366_v3  ;;  %347 = vmatpush3.bf16.msra.mxu1 %v367_v4  ;;  %p487_p0 = por %p486_p13, %p485_p12 }
  0x46   :  { %p488_p1 = pnand %p487_p0, %p481_p11 }
  0x47   :  { %341 = vmatmul.mubr.msk.bf16.vlgmr.msra.gmra.mxu0 %vm114_vm1, %v93_v8  ;;  %349 = vmatmul.mubr.msk.bf16.vlgmr.msra.gmra.mxu1 %vm114_vm1, %v90_v10 }
 0x107   :  { %v152_v11 = vpop.f32.mrf.mxu0  ;;  %v208_v12 = vpop.f32.mrf.mxu1 }
 0x108   :  { %v209_v14 = vadd.f32 %v208_v12, %v152_v11 }
 0x109   :  { %v342_v15 = vpop.f32.mrf.mxu0  ;;  %v350_v16 = vpop.f32.mrf.mxu1 }
 0x10a   :  { %v220_v17 = vadd.f32 %v327_v13, %v209_v14 }
 0x10b   :  { %v155_v18 = vpop.f32.mrf.mxu0  ;;  %v211_v19 = vpop.f32.mrf.mxu1 }
 0x10c   :  { %v212_v20 = vadd.f32 %v211_v19, %v155_v18  ;;  %222 = vadd.xlane.f32.xlu0 %v220_v17  ;;  %v228_v22 = vmul.f32 %v220_v17, %v220_v17 }
 0x10d   :  { %v343_v21 = vpop.f32.mrf.mxu0  ;;  %v351_v23 = vpop.f32.mrf.mxu1 }
 0x10e   :  { %v221_v24 = vadd.f32 %v327_v13, %v212_v20  ;;  %230 = vadd.xlane.f32.xlu1 %v228_v22 }
 0x110   :  { %224 = vadd.xlane.f32.xlu0 %v221_v24  ;;  %v229_v25 = vmul.f32 %v221_v24, %v221_v24 }
 0x112   :  { %232 = vadd.xlane.f32.xlu1 %v229_v25 }
 0x195   :  { %v223_v26 = vpop.xlane.xlu0 %222 }
 0x196   :  { %v226_v27 = vmul.f32 0.03125, %v223_v26 }
 0x197   :  { %v231_v28 = vpop.xlane.xlu1 %230 }
 0x198   :  { %v236_v29 = vmul.f32 %v226_v27, %v226_v27  ;;  %v234_v30 = vmul.f32 0.03125, %v231_v28  ;;  %v242_v42 = vsub.f32 %v220_v17, %v226_v27 }
 0x199   :  { %v225_v31 = vpop.xlane.xlu0 %224 }
 0x19a   :  { %v238_v32 = vsub.f32 %v234_v30, %v236_v29  ;;  %v227_v33 = vmul.f32 0.03125, %v225_v31 }
 0x19b   :  { %v233_v34 = vpop.xlane.xlu1 %232 }
 0x19c   :  { %v240_v35 = vmax.f32 %v238_v32, 0.0  ;;  %v237_v36 = vmul.f32 %v227_v33, %v227_v33  ;;  %v235_v37 = vmul.f32 0.03125, %v233_v34  ;;  %v243_v47 = vsub.f32 %v221_v24, %v227_v33 }
 0x19e   :  { %v244_v38 = vadd.f32 1e-05, %v240_v35  ;;  %v239_v39 = vsub.f32 %v235_v37, %v237_v36 }
 0x1a0   :  { %368 = vrsqrt.f32 %v244_v38  ;;  %v241_v40 = vmax.f32 %v239_v39, 0.0 }
 0x1a2   :  { %v245_v41 = vadd.f32 1e-05, %v241_v40 }
 0x1a4   :  { %370 = vrsqrt.f32 %v245_v41 }
 0x1ad   :  { %v369_v43 = vpop.eup %368 }
 0x1ae   :  { %v248_v45 = vmul.f32 %v369_v43, %v242_v42 }
 0x1b0   :  { %v255_v48 = vmul.f32 %v328_v44, %v248_v45 }
 0x1b1   :  { %v371_v49 = vpop.eup %370 }
 0x1b2   :  { %v249_v50 = vmul.f32 %v371_v49, %v243_v47  ;;  %v262_v51 = vadd.f32 %v329_v46, %v255_v48 }
 0x1b4   :  { %v256_v52 = vmul.f32 %v328_v44, %v249_v50  ;;  %v270_v53 = vand.u32 2147483647, %v262_v51  ;;  %v264_v8 = vmax.f32 %v262_v51, 0.0  ;;  %vm266_vm3 = vcmp.ne.f32.partialorder %v262_v51, %v262_v51 }
 0x1b6   :  { %v263_v54 = vadd.f32 %v329_v46, %v256_v52  ;;  %v272_v55 = vsub.f32 0.0, %v270_v53 }
 0x1b8   :  { %v271_v56 = vand.u32 2147483647, %v263_v54  ;;  %v274_v57 = vmul.f32 1.442695, %v272_v55  ;;  %v265_v15 = vmax.f32 %v263_v54, 0.0  ;;  %vm267_vm5 = vcmp.ne.f32.partialorder %v263_v54, %v263_v54 }
 0x1ba   :  { %v273_v58 = vsub.f32 0.0, %v271_v56  ;;  %372 = vpow2.f32 %v274_v57 }
 0x1bc   :  { %v276_v59 = vmul.f32 1.442695, %v273_v58 }
 0x1be   :  { %374 = vpow2.f32 %v276_v59 }
 0x1c7   :  { %v373_v60 = vpop.eup %372 }
 0x1c8   :  { %v278_v61 = vadd.f32 1.0, %v373_v60  ;;  %v281_v0 = vmul.f32 -0.5, %v373_v60  ;;  %v284_v3 = vand.u32 2147483647, %v373_v60 }
 0x1ca   :  { %376 = vlog2.f32 %v278_v61  ;;  %v282_v1 = vadd.f32 1.0, %v281_v0  ;;  %vm285_vm2 = vcmp.lt.f32.partialorder %v284_v3, 0.0004427343 }
 0x1cb   :  { %v375_v62 = vpop.eup %374 }
 0x1cc   :  { %v287_v63 = vadd.f32 1.0, %v375_v62  ;;  %v290_v2 = vmul.f32 -0.5, %v375_v62  ;;  %v283_v6 = vmul.f32 %v373_v60, %v282_v1  ;;  %v293_v9 = vand.u32 2147483647, %v375_v62 }
 0x1ce   :  { %378 = vlog2.f32 %v287_v63  ;;  %v291_v7 = vadd.f32 1.0, %v290_v2  ;;  %vm294_vm4 = vcmp.lt.f32.partialorder %v293_v9, 0.0004427343 }
 0x1d0   :  { %v292_v14 = vmul.f32 %v375_v62, %v291_v7 }
 0x1d7   :  { %v377_v4 = vpop.eup %376 }
 0x1d8   :  { %v280_v5 = vmul.f32 0.6931472, %v377_v4 }
 0x1da   :  { %v286_v10 = vsel %vm285_vm2, %v283_v6, %v280_v5 }
 0x1db   :  { %v379_v11 = vpop.eup %378  ;;  %v296_v12 = vadd.f32 %v286_v10, %v264_v8 }
 0x1dc   :  { %v289_v13 = vmul.f32 0.6931472, %v379_v11 }
 0x1dd   :  { %v298_v16 = vsel %vm266_vm3, %v262_v51, %v296_v12 }
 0x1de   :  { %v295_v17 = vsel %vm294_vm4, %v292_v14, %v289_v13  ;;  %300 = vst [vmem:[#allocation11] sm:$0xff] %v298_v16 }
 0x1df   :  { %v297_v18 = vadd.f32 %v295_v17, %v265_v15 }
 0x1e1   :  { %v299_v19 = vsel %vm267_vm5, %v263_v54, %v297_v18 }
 0x1e2   :  { %301 = vst [vmem:[#allocation11 + $0x8] sm:$0xff] %v299_v19 }
 0x1e3   :  { %491 = shalt.err (!%p488_p1)
}
 0x1e4   :  { %313 = dma.vmem_to_hbm [thread:$0]  %s308_s4, 256, %s582_s5, [#allocation4], %s509_s21, %s509_s21, %s510_s22  }
 0x1e5   :  { %506 = dma.done.wait [#allocation4], 256  }
 0x1e6   :  { %507 = vsyncadd [#allocation4], 4294967040 }
 0x1e7   :  { %317 = vsyncpa [#allocation3], 1 }
 0x1e8   :  { %318 = vsyncpa [#allocation6], 1 }
 0x1e9   :  { %319 = vsyncpa [#allocation9], 1 }
 0x1ea   :  { %320 = vsyncpa [#allocation4], 1 }

</bundles_post_ra>
